<compile_context>
chip_gen: v7x
topology: tpu7x:2x2x1
jax: 0.10.0
libtpu: 0.0.40
codegen_flags: <defaults>
</compile_context>

<pallas_src>
import jax
import jax.numpy as jnp
from jax.experimental import pallas as pl
from jax.experimental.pallas import tpu as pltpu


def _qnetwork_kernel(xT_ref, w1_ref, b1_ref, w2_ref, b2_ref, w3_ref, b3_ref,
                     out_ref):
    # Feature-major: xT_ref is (state_dim, tile_b) bf16; lane dim == batch.
    x = xT_ref[...]                                            # (S, tb) bf16
    # fc1 + relu:  W1 (64, S) @ x (S, tb) -> (64, tb), f32 accumulation.
    h1 = jnp.dot(w1_ref[...], x, preferred_element_type=jnp.float32)
    h1 = jnp.maximum(h1 + b1_ref[...], 0.0)                    # f32 VPU
    # fc2 + relu:  W2 (32, 64) @ h1 -> (32, tb)
    h2 = jnp.dot(w2_ref[...], h1.astype(jnp.bfloat16),
                 preferred_element_type=jnp.float32)
    h2 = jnp.maximum(h2 + b2_ref[...], 0.0)
    # fc3 (rows zero-padded to a sublane multiple of 8): (A_pad, 32) @ (32, tb)
    q = jnp.dot(w3_ref[...], h2.astype(jnp.bfloat16),
                preferred_element_type=jnp.float32)
    out_ref[...] = (q + b3_ref[...]).astype(out_ref.dtype)     # lane-dense store
    # TODO(synk): for DQN action selection, fuse argmax over the action rows
    # here and emit a (1, tile_b) row instead of (act_pad, tile_b) to shrink
    # writeback ~8x and drop the wrapper slice+transpose entirely.


def prepare_params(params):
    """One-time conversion of PyTorch-layout params into kernel layout.

    Weights keep their (out, in) layout (the kernel computes W @ X, so no
    transpose is ever needed); they are cast to bf16 for the MXU.  Biases
    become (out, 1) f32 columns (broadcast along the lane/batch dim).  The
    fc3 rows are zero-padded to a multiple of 8 so the output store is a
    dense (8, 128)-tiled `vst` instead of a masked partial store.
    """
    action_dim = params["fc3_w"].shape[0]
    act_pad = max(8, -(-action_dim // 8) * 8)
    pad = act_pad - action_dim
    return {
        "w1": params["fc1_w"].astype(jnp.bfloat16),                  # (64, S)
        "b1": params["fc1_b"].astype(jnp.float32).reshape(-1, 1),    # (64, 1)
        "w2": params["fc2_w"].astype(jnp.bfloat16),                  # (32, 64)
        "b2": params["fc2_b"].astype(jnp.float32).reshape(-1, 1),    # (32, 1)
        "w3": jnp.pad(params["fc3_w"], ((0, pad), (0, 0))).astype(jnp.bfloat16),
        "b3": jnp.pad(params["fc3_b"], (0, pad)).astype(jnp.float32).reshape(-1, 1),
        "action_dim": action_dim,
    }


def _pick_batch_tile(batch, per_col_bytes, vmem_budget=8 * 1024 * 1024):
    """Lane-aligned (multiple-of-128) power-of-two batch tile.

    Picks the largest tile <= 32768 that
      (a) keeps the double-buffered per-step VMEM footprint under
          `vmem_budget` (~8 MiB; fits v5e's 16 MiB scoped default),
      (b) keeps >= 2 grid steps once the batch allows it (v7x megacore), and
      (c) wastes at most ~1/8 of the padded batch in last-block zero padding.
    """
    max_tile = 128
    while max_tile * 2 <= 32768 and (max_tile * 2) * per_col_bytes <= vmem_budget:
        max_tile *= 2
    if batch <= 128:
        return 128
    best = 128
    t = 256
    while t <= max_tile:
        steps = -(-batch // t)
        padded = steps * t
        if steps >= 2 and (padded - batch) * 8 <= padded:
            best = t
        t *= 2
    return best


def qnetwork_forward(state, prep, out_dtype=jnp.float32):
    """state: (B, state_dim) f32.  prep: output of prepare_params().

    Returns (B, action_dim) Q-values in `out_dtype` (f32 by default, matching
    the PyTorch module; pass jnp.bfloat16 to halve output HBM writeback).
    """
    B, state_dim = state.shape
    w1, b1 = prep["w1"], prep["b1"]
    w2, b2 = prep["w2"], prep["b2"]
    w3, b3 = prep["w3"], prep["b3"]
    action_dim = prep["action_dim"]
    act_pad = w3.shape[0]
    out_itemsize = jnp.dtype(out_dtype).itemsize

    # Double-buffered bytes per batch column: bf16 input + output tile.
    per_col_bytes = 2 * (state_dim * 2 + act_pad * out_itemsize)
    tile_b = _pick_batch_tile(B, per_col_bytes)
    b_pad = -(-B // tile_b) * tile_b
    grid = (b_pad // tile_b,)

    # Layout plumbing: present activations feature-major (batch on the lane
    # dim), cast to bf16 and zero-pad the ragged tail in ONE fused XLA pass.
    xT = state.T.astype(jnp.bfloat16)                 # (state_dim, B) bf16
    if b_pad != B:
        xT = jnp.pad(xT, ((0, 0), (0, b_pad - B)))

    # Weights/biases: full-array blocks pinned to (0, 0) -> VMEM-resident
    # across every grid step (no re-DMA).
    resident = lambda arr: pl.BlockSpec(arr.shape, lambda i: (0, 0))

    # Explicit scoped-VMEM limit: computed footprint + headroom, floored at
    # the smallest per-chip default (16 MiB on v5e) so nothing silently OOMs.
    param_bytes = sum(int(a.size) * a.dtype.itemsize
                      for a in (w1, b1, w2, b2, w3, b3))
    footprint = tile_b * per_col_bytes + 2 * param_bytes
    vmem_limit = max(16 * 1024 * 1024, footprint + (4 * 1024 * 1024))

    # TODO(synk): sweep pipeline_mode=pl.Buffered(3) on the streamed input
    # spec (few-% win at most; left at the default double buffer).
    out_fm = pl.pallas_call(
        _qnetwork_kernel,
        out_shape=jax.ShapeDtypeStruct((act_pad, b_pad), out_dtype),
        grid_spec=pltpu.PrefetchScalarGridSpec(
            num_scalar_prefetch=0,
            grid=grid,
            in_specs=[
                pl.BlockSpec((state_dim, tile_b), lambda i: (0, i)),  # streamed
                resident(w1), resident(b1),
                resident(w2), resident(b2),
                resident(w3), resident(b3),
            ],
            out_specs=pl.BlockSpec((act_pad, tile_b), lambda i: (0, i)),
        ),
        compiler_params=pltpu.CompilerParams(
            dimension_semantics=("parallel",),        # megacore sharding on v7x
            vmem_limit_bytes=int(vmem_limit)),
    )(xT, w1, b1, w2, b2, w3, b3)

    # Strip padded rows/columns and return batch-major (B, action_dim),
    # matching the PyTorch module's output layout.  Callers that can consume
    # feature-major Q-values should use out_fm directly to skip this pass.
    return out_fm[:action_dim, :B].T


def init_params(key, state_dim, action_dim):
    """Deterministic init mirroring the layer shapes in QNetwork.__init__
    (PyTorch (out, in) weight layout, f32)."""
    ks = jax.random.split(key, 6)

    def lin(kw, kb, out_d, in_d):
        bound = 1.0 / jnp.sqrt(in_d)
        w = jax.random.uniform(kw, (out_d, in_d), jnp.float32, -bound, bound)
        b = jax.random.uniform(kb, (out_d,), jnp.float32, -bound, bound)
        return w, b

    fc1_w, fc1_b = lin(ks[0], ks[1], 64, state_dim)
    fc2_w, fc2_b = lin(ks[2], ks[3], 32, 64)
    fc3_w, fc3_b = lin(ks[4], ks[5], action_dim, 32)
    return {"fc1_w": fc1_w, "fc1_b": fc1_b,
            "fc2_w": fc2_w, "fc2_b": fc2_b,
            "fc3_w": fc3_w, "fc3_b": fc3_b}


def _reference(state, params):
    h1 = jnp.maximum(state @ params["fc1_w"].T + params["fc1_b"], 0.0)
    h2 = jnp.maximum(h1 @ params["fc2_w"].T + params["fc2_b"], 0.0)
    return h2 @ params["fc3_w"].T + params["fc3_b"]


if __name__ == "__main__":
    key = jax.random.PRNGKey(0)
    state_dim, action_dim, batch = 16, 4, 8

    k_param, k_state = jax.random.split(key)
    params = init_params(k_param, state_dim, action_dim)   # PyTorch layout
    prep = prepare_params(params)                          # one-time prep
    state = jax.random.normal(k_state, (batch, state_dim), jnp.float32)

    out = qnetwork_forward(state, prep)
    jax.block_until_ready(out)

    ref = _reference(state, params)   # f32 reference
    assert out.shape == (batch, action_dim)
    # bf16 states/weights on the MXU with f32 accumulation -> small quantization error.
    assert jnp.allclose(out, ref, atol=2e-2, rtol=2e-2), \
        float(jnp.max(jnp.abs(out - ref)))

    print("KERNEL_OK")
</pallas_src>

<mosaic_0001>
module attributes {stable_mosaic.version = 11 : i64} {
  func.func @_qnetwork_kernel(%arg0: i32, %arg1: memref<16x128xbf16, #tpu.memory_space<vmem>>, %arg2: memref<64x16xbf16, #tpu.memory_space<vmem>>, %arg3: memref<64x1xf32, #tpu.memory_space<vmem>>, %arg4: memref<32x64xbf16, #tpu.memory_space<vmem>>, %arg5: memref<32x1xf32, #tpu.memory_space<vmem>>, %arg6: memref<8x32xbf16, #tpu.memory_space<vmem>>, %arg7: memref<8x1xf32, #tpu.memory_space<vmem>>, %arg8: memref<8x128xf32, #tpu.memory_space<vmem>>) attributes {dimension_semantics = [#tpu.dimension_semantics<parallel>], iteration_bounds = array<i64: 1>, scalar_prefetch = 0 : i64, scratch_operands = 0 : i64, tpu.core_type = #tpu.core_type<tc>, window_params = [{transform_indices = @transform_0, window_bounds = array<i64: 16, 128>}, {pipeline_mode = #tpu.pipeline_mode<synchronous>, transform_indices = @transform_1, window_bounds = array<i64: 64, 16>}, {pipeline_mode = #tpu.pipeline_mode<synchronous>, transform_indices = @transform_2, window_bounds = array<i64: 64, 1>}, {pipeline_mode = #tpu.pipeline_mode<synchronous>, transform_indices = @transform_3, window_bounds = array<i64: 32, 64>}, {pipeline_mode = #tpu.pipeline_mode<synchronous>, transform_indices = @transform_4, window_bounds = array<i64: 32, 1>}, {pipeline_mode = #tpu.pipeline_mode<synchronous>, transform_indices = @transform_5, window_bounds = array<i64: 8, 32>}, {pipeline_mode = #tpu.pipeline_mode<synchronous>, transform_indices = @transform_6, window_bounds = array<i64: 8, 1>}, {transform_indices = @transform_7, window_bounds = array<i64: 8, 128>}]} {
    %c0 = arith.constant 0 : index
    %c0_0 = arith.constant 0 : index
    %0 = vector.load %arg1[%c0, %c0_0] : memref<16x128xbf16, #tpu.memory_space<vmem>>, vector<16x128xbf16>
    %c0_1 = arith.constant 0 : index
    %c0_2 = arith.constant 0 : index
    %1 = vector.load %arg2[%c0_1, %c0_2] : memref<64x16xbf16, #tpu.memory_space<vmem>>, vector<64x16xbf16>
    %cst = arith.constant dense<0.000000e+00> : vector<64x128xf32>
    %2 = tpu.matmul %1, %0, %cst {dimension_numbers = #tpu.dot_dimension_numbers<[1], [0], [0], [1], [0, 0, 1, 1], [], []>} : vector<64x16xbf16>, vector<16x128xbf16>, vector<64x128xf32> -> vector<64x128xf32>
    %c0_3 = arith.constant 0 : index
    %c0_4 = arith.constant 0 : index
    %3 = vector.load %arg3[%c0_3, %c0_4] : memref<64x1xf32, #tpu.memory_space<vmem>>, vector<64x1xf32>
    %4 = vector.broadcast %3 : vector<64x1xf32> to vector<64x128xf32>
    %5 = arith.addf %2, %4 : vector<64x128xf32>
    %cst_5 = arith.constant 0.000000e+00 : f32
    %6 = vector.broadcast %cst_5 : f32 to vector<64x128xf32>
    %7 = arith.maximumf %5, %6 : vector<64x128xf32>
    %c0_6 = arith.constant 0 : index
    %c0_7 = arith.constant 0 : index
    %8 = vector.load %arg4[%c0_6, %c0_7] : memref<32x64xbf16, #tpu.memory_space<vmem>>, vector<32x64xbf16>
    %9 = arith.truncf %7 : vector<64x128xf32> to vector<64x128xbf16>
    %cst_8 = arith.constant dense<0.000000e+00> : vector<32x128xf32>
    %10 = tpu.matmul %8, %9, %cst_8 {dimension_numbers = #tpu.dot_dimension_numbers<[1], [0], [0], [1], [0, 0, 1, 1], [], []>} : vector<32x64xbf16>, vector<64x128xbf16>, vector<32x128xf32> -> vector<32x128xf32>
    %c0_9 = arith.constant 0 : index
    %c0_10 = arith.constant 0 : index
    %11 = vector.load %arg5[%c0_9, %c0_10] : memref<32x1xf32, #tpu.memory_space<vmem>>, vector<32x1xf32>
    %12 = vector.broadcast %11 : vector<32x1xf32> to vector<32x128xf32>
    %13 = arith.addf %10, %12 : vector<32x128xf32>
    %cst_11 = arith.constant 0.000000e+00 : f32
    %14 = vector.broadcast %cst_11 : f32 to vector<32x128xf32>
    %15 = arith.maximumf %13, %14 : vector<32x128xf32>
    %c0_12 = arith.constant 0 : index
    %c0_13 = arith.constant 0 : index
    %16 = vector.load %arg6[%c0_12, %c0_13] : memref<8x32xbf16, #tpu.memory_space<vmem>>, vector<8x32xbf16>
    %17 = arith.truncf %15 : vector<32x128xf32> to vector<32x128xbf16>
    %cst_14 = arith.constant dense<0.000000e+00> : vector<8x128xf32>
    %18 = tpu.matmul %16, %17, %cst_14 {dimension_numbers = #tpu.dot_dimension_numbers<[1], [0], [0], [1], [0, 0, 1, 1], [], []>} : vector<8x32xbf16>, vector<32x128xbf16>, vector<8x128xf32> -> vector<8x128xf32>
    %c0_15 = arith.constant 0 : index
    %c0_16 = arith.constant 0 : index
    %19 = vector.load %arg7[%c0_15, %c0_16] : memref<8x1xf32, #tpu.memory_space<vmem>>, vector<8x1xf32>
    %20 = vector.broadcast %19 : vector<8x1xf32> to vector<8x128xf32>
    %21 = arith.addf %18, %20 : vector<8x128xf32>
    %c0_17 = arith.constant 0 : index
    %c0_18 = arith.constant 0 : index
    %22 = vector.load %arg8[%c0_17, %c0_18] : memref<8x128xf32, #tpu.memory_space<vmem>>, vector<8x128xf32>
    tpu.vector_store %arg8[%c0_17, %c0_18], %21 {strides = array<i32>} : memref<8x128xf32, #tpu.memory_space<vmem>>, vector<8x128xf32>,
    return
  }
  func.func @transform_0(%arg0: i32) -> (i32, i32) {
    %c0_i32 = arith.constant 0 : i32
    %c0_i32_0 = arith.constant 0 : i32
    return %c0_i32, %arg0 : i32, i32
  }
  func.func @transform_1(%arg0: i32) -> (i32, i32) {
    %c0_i32 = arith.constant 0 : i32
    %c0_i32_0 = arith.constant 0 : i32
    %c0_i32_1 = arith.constant 0 : i32
    return %c0_i32, %c0_i32_0 : i32, i32
  }
  func.func @transform_2(%arg0: i32) -> (i32, i32) {
    %c0_i32 = arith.constant 0 : i32
    %c0_i32_0 = arith.constant 0 : i32
    %c0_i32_1 = arith.constant 0 : i32
    return %c0_i32, %c0_i32_0 : i32, i32
  }
  func.func @transform_3(%arg0: i32) -> (i32, i32) {
    %c0_i32 = arith.constant 0 : i32
    %c0_i32_0 = arith.constant 0 : i32
    %c0_i32_1 = arith.constant 0 : i32
    return %c0_i32, %c0_i32_0 : i32, i32
  }
  func.func @transform_4(%arg0: i32) -> (i32, i32) {
    %c0_i32 = arith.constant 0 : i32
    %c0_i32_0 = arith.constant 0 : i32
    %c0_i32_1 = arith.constant 0 : i32
    return %c0_i32, %c0_i32_0 : i32, i32
  }
  func.func @transform_5(%arg0: i32) -> (i32, i32) {
    %c0_i32 = arith.constant 0 : i32
    %c0_i32_0 = arith.constant 0 : i32
    %c0_i32_1 = arith.constant 0 : i32
    return %c0_i32, %c0_i32_0 : i32, i32
  }
  func.func @transform_6(%arg0: i32) -> (i32, i32) {
    %c0_i32 = arith.constant 0 : i32
    %c0_i32_0 = arith.constant 0 : i32
    %c0_i32_1 = arith.constant 0 : i32
    return %c0_i32, %c0_i32_0 : i32, i32
  }
  func.func @transform_7(%arg0: i32) -> (i32, i32) {
    %c0_i32 = arith.constant 0 : i32
    %c0_i32_0 = arith.constant 0 : i32
    return %c0_i32, %arg0 : i32, i32
  }
}

</mosaic_0001>

<bundles_post_ra>
// kernel: tpu_custom_call.1
= control target key start
LH: loop header
LB: loop body
LE: loop exit
PB: predicated region body
PF: predicated region fallthrough
CT: control target
= control target key end

     0   :  { %vm112_vm0 = vcmask 130048   ;;  %v463_v3 = vmov 0   ;;  %s588_s0 = inlined_call_operand.vmem [shape: bf16[16,128], index: 0, kind: input, shape index: {}]   ;;  %s589_s1 = inlined_call_operand.vmem [shape: bf16[64,16], index: 1, kind: input, shape index: {}]   ;;  %s590_s2 = inlined_call_operand.vmem [shape: f32[64,1], index: 2, kind: input, shape index: {}]   ;;  %s591_s3 = inlined_call_operand.vmem [shape: bf16[32,64], index: 3, kind: input, shape index: {}]   ;;  %s592_s4 = inlined_call_operand.vmem [shape: f32[32,1], index: 4, kind: input, shape index: {}]   ;;  %s593_s5 = inlined_call_operand.vmem [shape: bf16[8,32], index: 5, kind: input, shape index: {}]   ;;  %s594_s6 = inlined_call_operand.vmem [shape: f32[8,1], index: 6, kind: input, shape index: {}]   ;;  %s595_s7 = inlined_call_operand.hbm [shape: f32[8,128], index: 7, kind: output, shape index: {}]  }
   0x1   :  { %v432_v0 = vld [vmem:[%s588_s0] sm:$0xff]   ;;  %v434_v2 = vld [vmem:[%s589_s1 + $0x8] sm:$0xff]   ;;  %430 = vset.pattern.permute.xlu0 %v463_v3  ;;  %v435_v4 = vld [vmem:[%s589_s1 + $0x10] sm:$0xff]   ;;  %431 = vset.pattern.permute.xlu1 %v463_v3 }
   0x2   :  { %v433_v1 = vld [vmem:[%s589_s1] sm:$0xff]   ;;  %396 = vmatprep.subr.bf16.mxu0 %v432_v0  ;;  %v40_v6 = vld [vmem:[%s590_s2 + $0x10] sm:$0xff]  ;;  %v39_v7 = vld [vmem:[%s590_s2 + $0x8] sm:$0xff] }
   0x3   :  { %397 = vmatpush3.bf16.msra.mxu0 %v432_v0  ;;  %398 = vmatprep.mubr.msk.bf16.mxu0 %vm112_vm0, %v433_v1  ;;  %v38_v5 = vld [vmem:[%s590_s2] sm:$0xff]  ;;  %v41_v8 = vld [vmem:[%s590_s2 + $0x18] sm:$0xff] }
   0x4   :  { %48 = vperm.xlu0 %430, %v38_v5   ;;  %58 = vperm.xlu1 %431, %v40_v6   ;;  %v436_v9 = vld [vmem:[%s589_s1 + $0x18] sm:$0xff]  }
   0x6   :  { %399 = vmatmul.mubr.msk.bf16.vlgmr.msra.gmra.mrb[0].mxu0 %vm112_vm0, %v434_v2 }
   0x7   :  { %402 = vmatprep.mubr.msk.bf16.mxu0 %vm112_vm0, %v435_v4 }
   0x8   :  { %53 = vperm.xlu0 %430, %v39_v7  }
   0x9   :  { %12 = vsyncpa [#allocation3], 0  ;;  %v42_v10 = vld [vmem:[%s590_s2 + $0x20] sm:$0xff]  ;;  %63 = vperm.xlu1 %431, %v41_v8   ;;  %v43_v11 = vld [vmem:[%s590_s2 + $0x28] sm:$0xff]  ;;  %vm240_vm1 = vcmask 523264   ;;  %v464_v57 = vmov 0.0  }
   0xa   :  { %v44_v12 = vld [vmem:[%s590_s2 + $0x30] sm:$0xff]  ;;  %v45_v13 = vld [vmem:[%s590_s2 + $0x38] sm:$0xff]  ;;  %v206_v14 = vld [vmem:[%s592_s4] sm:$0xff]  ;;  %418 = vmatprep.subr.bf16.mxu0 %v464_v57  ;;  %vm465_vm2 = vmmov 0   ;;  %vm309_vm3 = vcmask 261120   ;;  %s466_s13 = smov [#allocation2]  }
   0xb   :  { %v207_v15 = vld [vmem:[%s592_s4 + $0x8] sm:$0xff]  ;;  %v208_v16 = vld [vmem:[%s592_s4 + $0x10] sm:$0xff]  ;;  %v209_v17 = vld [vmem:[%s592_s4 + $0x18] sm:$0xff]  ;;  %s360_s14 = sshll.u32 %s466_s13, 4  ;;  %s361_s14 = int_to_ptr.vmem [resolvable:$true] %s360_s14 }
   0xc   :  { %68 = vperm.xlu0 %430, %v42_v10   ;;  %v303_v18 = vld [vmem:[%s594_s6] sm:$0xff]  ;;  %v438_v56 = vld [vmem:[%s591_s3 + $0x8] sm:$0xff]   ;;  %s439_s15 = scalar_lea.vmem %s361_s14, 128  ;;  %p444_p1 = scmp.lt.s32.totalorder %s361_s14, %s361_s14 }
   0xd   :  { %73 = vperm.xlu1 %431, %v43_v11   ;;  %v437_v19 = vld [vmem:[%s591_s3] sm:$0xff]   ;;  %p440_p0 = scmp.ne.s32.totalorder %s361_s14, %s439_s15  ;;  %p445_p2 = scmp.lt.s32.totalorder %s439_s15, %s439_s15 }
   0xe   :  { %403 = vmatmul.mubr.msk.bf16.gmra.mrb[4].mxu0 %vm112_vm0, %v436_v9  ;;  %414 = vmatprep.mubr.msk.bf16.mxu1 %vm240_vm1, %v437_v19 }
   0xf   :  { %422 = vmatprep.mubr.msk.bf16.mxu0 %vm465_vm2, %v464_v57  ;;  %p446_p3 = por %p445_p2, %p444_p1 }
  0x10   :  { %78 = vperm.xlu0 %430, %v44_v12   ;;  %v300_v12 = vld [vmem:[%s593_s5] sm:$0xf] }
  0x11   :  { %83 = vperm.xlu1 %431, %v45_v13   ;;  %p447_p4 = pnand %p446_p3, %p440_p0 }
  0x14   :  { %212 = vperm.xlu0 %430, %v206_v14  }
  0x15   :  { %217 = vperm.xlu1 %431, %v207_v15  }
  0x18   :  { %222 = vperm.xlu0 %430, %v208_v16  }
  0x19   :  { %227 = vperm.xlu1 %431, %v209_v17  }
  0x1c   :  { %306 = vperm.xlu0 %430, %v303_v18  }
  0x83   :  { %v49_v20 = vpop.permute.xlu0 %48  ;;  %v59_v21 = vpop.permute.xlu1 %58 }
  0x87   :  { %v54_v22 = vpop.permute.xlu0 %53 }
  0x88   :  { %v64_v23 = vpop.permute.xlu1 %63 }
  0x8b   :  { %v69_v27 = vpop.permute.xlu0 %68 }
  0x8c   :  { %v74_v32 = vpop.permute.xlu1 %73 }
  0x8f   :  { %v79_v39 = vpop.permute.xlu0 %78 }
  0x90   :  { %v84_v44 = vpop.permute.xlu1 %83 }
  0x93   :  { %v213_v58 = vpop.permute.xlu0 %212 }
  0x94   :  { %v218_v59 = vpop.permute.xlu1 %217 }
  0x97   :  { %v223_v60 = vpop.permute.xlu0 %222 }
  0x98   :  { %v228_v0 = vpop.permute.xlu1 %227 }
  0x9b   :  { %v307_v13 = vpop.permute.xlu0 %306 }
  0xd9   :  { %v400_v24 = vpop.f32.mrb[0].mxu0 }
  0xda   :  { %v168_v25 = vadd.f32 %v400_v24, %v59_v21  ;;  %v159_v26 = vpop.f32.mrb[1].mxu0 }
  0xdb   :  { %v160_v28 = vadd.f32 %v159_v26, %v49_v20  ;;  %v401_v29 = vpop.f32.mrb[2].mxu0 }
  0xdc   :  { %v171_v30 = vadd.f32 %v401_v29, %v64_v23  ;;  %v162_v31 = vpop.f32.mrb[3].mxu0  ;;  %v192_v34 = vmax.f32 %v168_v25, 0.0 }
  0xdd   :  { %v163_v33 = vadd.f32 %v162_v31, %v54_v22  ;;  %v190_v36 = vmax.f32 %v160_v28, 0.0 }
  0xde   :  { %v193_v35 = vmax.f32 %v171_v30, 0.0 }
  0xdf   :  { %v191_v37 = vmax.f32 %v163_v33, 0.0 }
  0xe0   :  { %v203_v38 = vpack.c.bf16 %v193_v35, %v192_v34 }
  0xe1   :  { %v404_v40 = vpop.f32.mrb[4].mxu0  ;;  %v202_v41 = vpack.c.bf16 %v191_v37, %v190_v36 }
  0xe2   :  { %v184_v42 = vadd.f32 %v404_v40, %v79_v39  ;;  %v175_v43 = vpop.f32.mrb[5].mxu0 }
  0xe3   :  { %v176_v45 = vadd.f32 %v175_v43, %v69_v27  ;;  %v405_v46 = vpop.f32.mrb[6].mxu0  ;;  %406 = vmatprep.subr.bf16.mxu1 %v202_v41 }
  0xe4   :  { %v187_v47 = vadd.f32 %v405_v46, %v84_v44  ;;  %v178_v48 = vpop.f32.mrb[7].mxu0  ;;  %407 = vmatpush3.bf16.msra.mxu1 %v202_v41  ;;  %v196_v50 = vmax.f32 %v184_v42, 0.0 }
  0xe5   :  { %v179_v49 = vadd.f32 %v178_v48, %v74_v32  ;;  %408 = vmatprep.subr.bf16.mxu1 %v203_v38  ;;  %v194_v52 = vmax.f32 %v176_v45, 0.0 }
  0xe6   :  { %v197_v51 = vmax.f32 %v187_v47, 0.0 }
  0xe7   :  { %v195_v53 = vmax.f32 %v179_v49, 0.0 }
  0xe8   :  { %v205_v54 = vpack.c.bf16 %v197_v51, %v196_v50  ;;  %409 = vmatpush3.bf16.msra.mxu1 %v203_v38 }
  0xe9   :  { %v204_v55 = vpack.c.bf16 %v195_v53, %v194_v52 }
  0xeb   :  { %410 = vmatprep.subr.bf16.mxu1 %v204_v55 }
  0xec   :  { %411 = vmatpush3.bf16.msra.mxu1 %v204_v55 }
  0xed   :  { %412 = vmatprep.subr.bf16.mxu1 %v205_v54 }
  0xf0   :  { %413 = vmatpush3.bf16.msra.mxu1 %v205_v54 }
  0xf3   :  { %415 = vmatmul.mubr.msk.bf16.vlgmr.msra.gmra.mrb[0].mxu1 %vm240_vm1, %v438_v56 }
 0x1c6   :  { %v416_v61 = vpop.f32.mrb[0].mxu1 }
 0x1c7   :  { %v290_v62 = vadd.f32 %v416_v61, %v223_v60  ;;  %v281_v63 = vpop.f32.mrb[1].mxu1 }
 0x1c8   :  { %v282_v1 = vadd.f32 %v281_v63, %v213_v58  ;;  %v417_v2 = vpop.f32.mrb[2].mxu1 }
 0x1c9   :  { %v293_v3 = vadd.f32 %v417_v2, %v228_v0  ;;  %v284_v4 = vpop.f32.mrb[3].mxu1  ;;  %v298_v6 = vmax.f32 %v290_v62, 0.0 }
 0x1ca   :  { %v285_v5 = vadd.f32 %v284_v4, %v218_v59  ;;  %v296_v8 = vmax.f32 %v282_v1, 0.0 }
 0x1cb   :  { %v299_v7 = vmax.f32 %v293_v3, 0.0 }
 0x1cc   :  { %v297_v9 = vmax.f32 %v285_v5, 0.0 }
 0x1cd   :  { %v302_v10 = vpack.c.bf16 %v299_v7, %v298_v6 }
 0x1ce   :  { %v301_v11 = vpack.c.bf16 %v297_v9, %v296_v8 }
 0x1d0   :  { %419 = vmatpush3.bf16.msra.mxu0 %v301_v11 }
 0x1d1   :  { %420 = vmatprep.subr.bf16.mxu0 %v464_v57 }
 0x1d4   :  { %421 = vmatpush3.bf16.msra.mxu0 %v302_v10 }
 0x1d7   :  { %423 = vmatmul.mubr.msk.bf16.vlgmr.msra.gmra.mrb[8].mxu0 %vm309_vm3, %v300_v12 }
 0x2aa   :  { %v347_v14 = vpop.f32.mrb[8].mxu0 }
 0x2ab   :  { %v348_v15 = vadd.f32 %v347_v14, %v307_v13  ;;  %v424_v16 = vpop.f32.mrb[9].mxu0 }
 0x2ac   :  { %v350_v17 = vpop.f32.mrb[10].mxu0 }
 0x2ad   :  { %353 = vst [vmem:[#allocation2] sm:$0xff] %v348_v15  ;;  %v425_v18 = vpop.f32.mrb[11].mxu0 }
 0x2ae   :  { %450 = shalt.err (!%p447_p4)
}
 0x2af   :  { %s451_s17 = scalar_lea.hbm %s595_s7, 128 }
 0x2b0   :  { %p452_p5 = scmp.ne.s32.totalorder %s595_s7, %s451_s17  ;;  %p455_p6 = scmp.lt.u32.totalorder %s451_s17, %s595_s7 }
 0x2b2   :  { %p457_p7 = pnand %p455_p6, %p452_p5 }
 0x2b4   :  { %460 = shalt.err (!%p457_p7)
}
 0x2b5   :  { %363 = dma.vmem_to_hbm [thread:$0]  %s361_s14, 128, %s595_s7, [#allocation3]  }
 0x2b6   :  { %461 = dma.done.wait [#allocation3], 128  }
 0x2b7   :  { %462 = vsyncadd [#allocation3], 4294967168 }
 0x2b8   :  { %367 = vsyncpa [#allocation3], 1 }

</bundles_post_ra>
